<compile_context>
chip_gen: v7x
topology: tpu7x:2x2x1
jax: 0.10.0
libtpu: 0.0.40
codegen_flags: <defaults>
</compile_context>

<pallas_src>
import math

import numpy as np
import jax
import jax.numpy as jnp
from jax.experimental import pallas as pl
from jax.experimental.pallas import tpu as pltpu


def _round_up(x: int, m: int) -> int:
    return ((x + m - 1) // m) * m


def _lane_width(d: int, target: int = 512) -> int:
    """Smallest lane width >= ~target that is a multiple of 128 and of d."""
    base = 128 * d // math.gcd(128, d)        # multiple of 128, divisible by d
    if base >= target:
        return base
    return base * (target // base)


def time_encoder_kernel(ts_ref, freq_ref, phase_ref, out_ref):
    # ts_ref:    (SUB, W) f32  -- timestamps, already element-repeated x D along lanes
    # freq_ref:  (1, W)   f32  -- basis_freq tiled W//D times (resident, loaded once)
    # phase_ref: (1, W)   f32  -- phase tiled W//D times
    # out_ref:   (SUB, W) out_dtype
    # Single hoisted expression: (1, W) broadcasts over sublanes, all lanes used,
    # stores are unmasked full-lane vst.
    out_ref[...] = jnp.cos(
        ts_ref[...] * freq_ref[...] + phase_ref[...]
    ).astype(out_ref.dtype)


def time_encoder_forward(ts, basis_freq, phase, *,
                         lane_tile: int = 512,
                         sublane_tile: int = 1024,
                         out_dtype=jnp.float32):
    """ts: (B, S) float; basis_freq/phase: (D,) float -> (B, S, D) out_dtype."""
    B, S = ts.shape
    D = int(basis_freq.shape[0])
    N = B * S
    total = N * D

    ts = ts.astype(jnp.float32)
    basis_freq = basis_freq.astype(jnp.float32)
    phase = phase.astype(jnp.float32)

    # Lane-dense flat layout: W is a multiple of 128 and of D.
    W = _lane_width(D, lane_tile)
    sublane_tile = max(8, _round_up(sublane_tile, 8))

    # Layout plumbing in XLA (cheap, input side is D x smaller than the output):
    # repeat each timestamp D times so the flat slab matches row-major (B,S,D).
    ts_rep = jnp.repeat(ts.reshape(-1), D)                      # (N*D,)

    R = pl.cdiv(total, W)                                       # rows of the 2-D slab
    SUB = min(sublane_tile, _round_up(R, 8))                    # sublanes per block
    R_pad = _round_up(R, SUB)
    pad = R_pad * W - total
    if pad:
        ts_rep = jnp.pad(ts_rep, (0, pad))
    ts2d = ts_rep.reshape(R_pad, W)                             # (R_pad, W)

    # freq/phase tiled to lane width: value at lane w is param[w % D].
    freq_t = jnp.tile(basis_freq, W // D).reshape(1, W)
    phase_t = jnp.tile(phase, W // D).reshape(1, W)

    grid = (R_pad // SUB,)

    out2d = pl.pallas_call(
        time_encoder_kernel,
        out_shape=jax.ShapeDtypeStruct((R_pad, W), out_dtype),
        grid=grid,
        in_specs=[
            pl.BlockSpec((SUB, W), lambda i: (i, 0)),   # ts slab tile
            pl.BlockSpec((1, W), lambda i: (0, 0)),     # freq (resident)
            pl.BlockSpec((1, W), lambda i: (0, 0)),     # phase (resident)
        ],
        out_specs=pl.BlockSpec((SUB, W), lambda i: (i, 0)),
        compiler_params=pltpu.CompilerParams(
            # 1-D grid of independent row tiles: shard across TCs on v7x.
            dimension_semantics=("parallel",),
        ),
    )(ts2d, freq_t, phase_t)

    # Contiguous un-pad + reshape back to (B, S, D) -- pure layout, no transpose.
    out = out2d.reshape(-1)[:total].reshape(B, S, D)
    return out


def make_params(expand_dim=2):
    """Deterministic parameter init mirroring TimeEncoder.__init__."""
    time_dim = expand_dim
    basis_freq = jnp.asarray(
        1.0 / 10 ** np.linspace(0, 9, time_dim), dtype=jnp.float32
    )
    phase = jnp.zeros((time_dim,), dtype=jnp.float32)
    return basis_freq, phase


def _reference(ts, basis_freq, phase):
    return jnp.cos(ts[:, :, None] * basis_freq[None, None, :] + phase[None, None, :])


if __name__ == "__main__":
    # Small config matching the module defaults (expand_dim=2).
    B, S, D = 2, 8, 2
    key = jax.random.PRNGKey(0)
    ts = jax.random.uniform(key, (B, S), dtype=jnp.float32) * 100.0
    basis_freq, phase = make_params(expand_dim=D)

    out = jax.block_until_ready(time_encoder_forward(ts, basis_freq, phase))
    ref = _reference(ts, basis_freq, phase)
    assert out.shape == (B, S, D)
    np.testing.assert_allclose(np.asarray(out), np.asarray(ref), rtol=1e-5, atol=1e-5)

    # Second small config that exercises a multi-step grid and the padding path.
    B2, S2, D2 = 2, 1000, 2
    ts2 = jax.random.uniform(jax.random.PRNGKey(1), (B2, S2), dtype=jnp.float32) * 50.0
    bf2, ph2 = make_params(expand_dim=D2)
    out2 = jax.block_until_ready(
        time_encoder_forward(ts2, bf2, ph2, lane_tile=256, sublane_tile=8)
    )
    ref2 = _reference(ts2, bf2, ph2)
    assert out2.shape == (B2, S2, D2)
    np.testing.assert_allclose(np.asarray(out2), np.asarray(ref2), rtol=1e-5, atol=1e-5)

    print("KERNEL_OK")
</pallas_src>

<mosaic_0001>
module attributes {stable_mosaic.version = 11 : i64} {
  func.func @time_encoder_kernel(%arg0: i32, %arg1: memref<8x512xf32, #tpu.memory_space<vmem>>, %arg2: memref<1x512xf32, #tpu.memory_space<vmem>>, %arg3: memref<1x512xf32, #tpu.memory_space<vmem>>, %arg4: memref<8x512xf32, #tpu.memory_space<vmem>>) attributes {dimension_semantics = [#tpu.dimension_semantics<parallel>], iteration_bounds = array<i64: 1>, scalar_prefetch = 0 : i64, scratch_operands = 0 : i64, tpu.core_type = #tpu.core_type<tc>, window_params = [{transform_indices = @transform_0, window_bounds = array<i64: 8, 512>}, {pipeline_mode = #tpu.pipeline_mode<synchronous>, transform_indices = @transform_1, window_bounds = array<i64: 1, 512>}, {pipeline_mode = #tpu.pipeline_mode<synchronous>, transform_indices = @transform_2, window_bounds = array<i64: 1, 512>}, {transform_indices = @transform_3, window_bounds = array<i64: 8, 512>}]} {
    %c0 = arith.constant 0 : index
    %c0_0 = arith.constant 0 : index
    %0 = vector.load %arg1[%c0, %c0_0] : memref<8x512xf32, #tpu.memory_space<vmem>>, vector<8x512xf32>
    %c0_1 = arith.constant 0 : index
    %c0_2 = arith.constant 0 : index
    %1 = vector.load %arg2[%c0_1, %c0_2] : memref<1x512xf32, #tpu.memory_space<vmem>>, vector<1x512xf32>
    %2 = vector.broadcast %1 : vector<1x512xf32> to vector<8x512xf32>
    %3 = arith.mulf %0, %2 : vector<8x512xf32>
    %c0_3 = arith.constant 0 : index
    %c0_4 = arith.constant 0 : index
    %4 = vector.load %arg3[%c0_3, %c0_4] : memref<1x512xf32, #tpu.memory_space<vmem>>, vector<1x512xf32>
    %5 = vector.broadcast %4 : vector<1x512xf32> to vector<8x512xf32>
    %6 = arith.addf %3, %5 : vector<8x512xf32>
    %7 = math.cos %6 : vector<8x512xf32>
    %c0_5 = arith.constant 0 : index
    %c0_6 = arith.constant 0 : index
    %8 = vector.load %arg4[%c0_5, %c0_6] : memref<8x512xf32, #tpu.memory_space<vmem>>, vector<8x512xf32>
    tpu.vector_store %arg4[%c0_5, %c0_6], %7 {strides = array<i32>} : memref<8x512xf32, #tpu.memory_space<vmem>>, vector<8x512xf32>,
    return
  }
  func.func @transform_0(%arg0: i32) -> (i32, i32) {
    %c0_i32 = arith.constant 0 : i32
    %c0_i32_0 = arith.constant 0 : i32
    return %arg0, %c0_i32 : i32, i32
  }
  func.func @transform_1(%arg0: i32) -> (i32, i32) {
    %c0_i32 = arith.constant 0 : i32
    %c0_i32_0 = arith.constant 0 : i32
    %c0_i32_1 = arith.constant 0 : i32
    return %c0_i32, %c0_i32_0 : i32, i32
  }
  func.func @transform_2(%arg0: i32) -> (i32, i32) {
    %c0_i32 = arith.constant 0 : i32
    %c0_i32_0 = arith.constant 0 : i32
    %c0_i32_1 = arith.constant 0 : i32
    return %c0_i32, %c0_i32_0 : i32, i32
  }
  func.func @transform_3(%arg0: i32) -> (i32, i32) {
    %c0_i32 = arith.constant 0 : i32
    %c0_i32_0 = arith.constant 0 : i32
    return %arg0, %c0_i32 : i32, i32
  }
}

</mosaic_0001>

<bundles_post_ra>
// kernel: tpu_custom_call.1
= control target key start
LH: loop header
LB: loop body
LE: loop exit
PB: predicated region body
PF: predicated region fallthrough
CT: control target
= control target key end

     0   :  { %8 = vsyncpa [#allocation3], 0  ;;  %s1013_s0 = inlined_call_operand.hbm [shape: f32[8,512], index: 0, kind: input, shape index: {}]   ;;  %s1014_s1 = inlined_call_operand.hbm [shape: f32[1,512], index: 1, kind: input, shape index: {}]   ;;  %s1015_s2 = inlined_call_operand.vmem [shape: f32[1,512], index: 2, kind: input, shape index: {}]   ;;  %s1016_s3 = inlined_call_operand.hbm [shape: f32[8,512], index: 3, kind: output, shape index: {}]  }
   0x1   :  { %9 = vsyncpa [#allocation6], 0 }
   0x2   :  { %10 = vsyncpa [#allocation4], 0  ;;  %s656_s12 = smov [#allocation2]   ;;  %s657_s14 = smov [#allocation5]  }
   0x3   :  { %s17_s13 = sshll.u32 %s656_s12, 4  ;;  %s27_s15 = sshll.u32 %s657_s14, 4  ;;  %s18_s13 = int_to_ptr.vmem [resolvable:$true] %s17_s13  ;;  %s28_s15 = int_to_ptr.vmem [resolvable:$true] %s27_s15 }
   0x4   :  { %s584_s18 = scalar_lea.hbm %s1013_s0, 512 }
   0x5   :  { %p585_p0 = scmp.ne.s32.totalorder %s1013_s0, %s584_s18  ;;  %p588_p1 = scmp.lt.u32.totalorder %s584_s18, %s1013_s0 }
   0x7   :  { %p590_p2 = pnand %p588_p1, %p585_p0 }
   0x9   :  { %593 = shalt.err (!%p590_p2)
}
   0xa   :  { %s594_s23 = scalar_lea.vmem %s18_s13, 512  ;;  %p599_p4 = scmp.lt.s32.totalorder %s18_s13, %s18_s13 }
   0xb   :  { %p595_p3 = scmp.ne.s32.totalorder %s18_s13, %s594_s23  ;;  %p600_p5 = scmp.lt.s32.totalorder %s594_s23, %s594_s23 }
   0xd   :  { %p601_p6 = por %p600_p5, %p599_p4 }
   0xf   :  { %p602_p7 = pnand %p601_p6, %p595_p3 }
  0x11   :  { %605 = shalt.err (!%p602_p7)
}
  0x12   :  { %20 = dma.hbm_to_vmem [thread:$0]  %s1013_s0, 512, %s18_s13, [#allocation3]  }
  0x13   :  { %s606_s28 = scalar_lea.hbm %s1014_s1, 64 }
  0x14   :  { %p607_p8 = scmp.ne.s32.totalorder %s1014_s1, %s606_s28  ;;  %p610_p9 = scmp.lt.u32.totalorder %s606_s28, %s1014_s1 }
  0x16   :  { %p612_p10 = pnand %p610_p9, %p607_p8 }
  0x18   :  { %615 = shalt.err (!%p612_p10)
}
  0x19   :  { %s616_s6 = scalar_lea.vmem %s28_s15, 64  ;;  %p621_p12 = scmp.lt.s32.totalorder %s28_s15, %s28_s15 }
  0x1a   :  { %p617_p11 = scmp.ne.s32.totalorder %s28_s15, %s616_s6  ;;  %p622_p13 = scmp.lt.s32.totalorder %s616_s6, %s616_s6 }
  0x1c   :  { %p623_p0 = por %p622_p13, %p621_p12 }
  0x1e   :  { %p624_p1 = pnand %p623_p0, %p617_p11 }
  0x20   :  { %627 = shalt.err (!%p624_p1)
}
  0x21   :  { %30 = dma.hbm_to_vmem [thread:$0]  %s1014_s1, 64, %s28_s15, [#allocation6]  }
  0x22   :  { %650 = dma.done.wait [#allocation3], 512  }
  0x23   :  { %651 = vsyncadd [#allocation3], 4294966784 }
  0x24   :  { %652 = dma.done.wait [#allocation6], 64  }
  0x25   :  { %653 = vsyncadd [#allocation6], 4294967232  ;;  %v45_v0 = vlaneseq  ;;  %v39_v5 = vld [vmem:[#allocation2] sm:$0xff]  ;;  %v40_v6 = vld [vmem:[#allocation2 + $0x8] sm:$0xff]  ;;  %v658_v55 = vmov 683565275  }
  0x26   :  { %v41_v7 = vld [vmem:[#allocation2 + $0x10] sm:$0xff]  ;;  %v43_v8 = vld [vmem:[#allocation5] sm:$0xf]  ;;  %v42_v28 = vld [vmem:[#allocation2 + $0x18] sm:$0xff]  ;;  %v659_v57 = vmov 2475754826  }
  0x27   :  { %v46_v1 = vshrl.u32 %v45_v0, 7  ;;  %v69_v9 = vld [vmem:[%s1015_s2] sm:$0xf]  ;;  %v660_v59 = vmov 2131351028   ;;  %s664_s1 = smov [#allocation7]  }
  0x28   :  { %v661_v61 = vmov 2102212464   ;;  %v662_v63 = vmov 920167782   ;;  %s517_s2 = sshll.u32 %s664_s1, 4  ;;  %s518_s2 = int_to_ptr.vmem [resolvable:$true] %s517_s2 }
  0x29   :  { %v47_v2 = vsub.s32 0, %v46_v1  ;;  %v51_v3 = vsub.s32 1, %v46_v1  ;;  %v55_v4 = vsub.s32 2, %v46_v1  ;;  %v59_v19 = vsub.s32 3, %v46_v1  ;;  %s628_s10 = scalar_lea.vmem %s518_s2, 512  ;;  %p633_p3 = scmp.lt.s32.totalorder %s518_s2, %s518_s2 }
  0x2a   :  { %p629_p2 = scmp.ne.s32.totalorder %s518_s2, %s628_s10  ;;  %p634_p4 = scmp.lt.s32.totalorder %s628_s10, %s628_s10 }
  0x2b   :  { %v48_v10 = vrot.slane %v43_v8, %v47_v2  ;;  %v52_v11 = vrot.slane %v43_v8, %v51_v3  ;;  %v56_v12 = vrot.slane %v43_v8, %v55_v4  ;;  %v74_v13 = vrot.slane %v69_v9, %v47_v2 }
  0x2c   :  { %v78_v14 = vrot.slane %v69_v9, %v51_v3  ;;  %v82_v15 = vrot.slane %v69_v9, %v55_v4  ;;  %v60_v25 = vrot.slane %v43_v8, %v59_v19  ;;  %v86_v36 = vrot.slane %v69_v9, %v59_v19  ;;  %p635_p5 = por %p634_p4, %p633_p3 }
  0x2d   :  { %v65_v16 = vmul.f32 %v48_v10, %v39_v5  ;;  %v66_v17 = vmul.f32 %v52_v11, %v40_v6  ;;  %v67_v18 = vmul.f32 %v56_v12, %v41_v7  ;;  %v663_v7 = vmov 1326507024  }
  0x2e   :  { %v68_v35 = vmul.f32 %v60_v25, %v42_v28  ;;  %p636_p6 = pnand %p635_p5, %p629_p2 }
  0x2f   :  { %v712_v20 = vadd.f32 %v74_v13, %v65_v16  ;;  %v714_v21 = vadd.f32 %v78_v14, %v66_v17  ;;  %v716_v22 = vadd.f32 %v82_v15, %v67_v18 }
  0x30   :  { %v727_v44 = vadd.f32 %v86_v36, %v68_v35 }
  0x31   :  { %v95_v23 = vand.u32 2147483647, %v712_v20  ;;  %v98_v24 = vand.u32 2139095040, %v712_v20  ;;  %v198_v26 = vand.u32 2147483647, %v714_v21  ;;  %v201_v27 = vand.u32 2139095040, %v714_v21 }
  0x32   :  { %v304_v33 = vand.u32 2139095040, %v716_v22  ;;  %v301_v49 = vand.u32 2147483647, %v716_v22  ;;  %vm97_vm13 = vcmp.lt.s32.totalorder %v712_v20, 0 }
  0x33   :  { %v99_v29 = vshrl.u32 %v98_v24, 23  ;;  %v102_v30 = vand.u32 8388607, %v95_v23  ;;  %v202_v31 = vshrl.u32 %v201_v27, 23  ;;  %v205_v32 = vand.u32 8388607, %v198_v26 }
  0x34   :  { %v305_v38 = vshrl.u32 %v304_v33, 23 }
  0x35   :  { %v527_v34 = vadd.s32 4294967169, %v99_v29  ;;  %v531_v37 = vadd.s32 4294967169, %v202_v31  ;;  %v103_v40 = vor.u32 8388608, %v102_v30  ;;  %v206_v41 = vor.u32 8388608, %v205_v32 }
  0x36   :  { %v535_v43 = vadd.s32 4294967169, %v305_v38 }
  0x37   :  { %v105_v39 = vadd.s32 1, %v527_v34  ;;  %v208_v42 = vadd.s32 1, %v531_v37  ;;  %v730_v50 = vshll.u32 %v103_v40, 8  ;;  %v732_v52 = vshll.u32 %v206_v41, 8 }
  0x38   :  { %v734_v53 = vadd.s32 1, %v535_v43 }
  0x39   :  { %vm106_vm0 = vcmp.gt.s32.totalorder %v105_v39, 0  ;;  %vm209_vm1 = vcmp.gt.s32.totalorder %v208_v42, 0 }
  0x3a   :  { %v107_v45 = vsel %vm106_vm0, %v105_v39, 0  ;;  %v210_v48 = vsel %vm209_vm1, %v208_v42, 0  ;;  %vm312_vm6 = vcmp.gt.s32.totalorder %v734_v53, 0 }
  0x3b   :  { %v108_v46 = vshrl.u32 %v107_v45, 5  ;;  %v109_v47 = vand.u32 31, %v107_v45  ;;  %v212_v51 = vand.u32 31, %v210_v48  ;;  %v741_v1 = vshrl.u32 %v210_v48, 5 }
  0x3d   :  { %v110_v54 = vsub.s32 32, %v109_v47  ;;  %v112_v56 = vshll.u32 %v658_v55, %v109_v47  ;;  %v115_v58 = vshll.u32 %v659_v57, %v109_v47  ;;  %v118_v60 = vshll.u32 %v660_v59, %v109_v47 }
  0x3e   :  { %v121_v62 = vshll.u32 %v661_v61, %v109_v47  ;;  %v124_v0 = vshll.u32 %v662_v63, %v109_v47  ;;  %vm127_vm2 = vcmp.lt.s32.totalorder %v108_v46, 1  ;;  %vm128_vm3 = vcmp.lt.s32.totalorder %v108_v46, 2 }
  0x3f   :  { %v111_v2 = vshrl.u32 %v658_v55, %v110_v54  ;;  %v113_v3 = vshrl.u32 %v659_v57, %v110_v54  ;;  %v116_v4 = vshrl.u32 %v660_v59, %v110_v54  ;;  %v119_v5 = vshrl.u32 %v661_v61, %v110_v54 }
  0x40   :  { %v122_v6 = vshrl.u32 %v662_v63, %v110_v54  ;;  %v125_v8 = vshrl.u32 %v663_v7, %v110_v54  ;;  %vm130_vm4 = vcmp.lt.s32.totalorder %v108_v46, 4  ;;  %v213_v12 = vsub.s32 32, %v212_v51 }
  0x41   :  { %v114_v9 = vor.u32 %v113_v3, %v112_v56  ;;  %v117_v10 = vor.u32 %v116_v4, %v115_v58  ;;  %v120_v11 = vor.u32 %v119_v5, %v118_v60  ;;  %vm129_vm5 = vcmp.lt.s32.totalorder %v108_v46, 3 }
  0x42   :  { %v123_v13 = vor.u32 %v122_v6, %v121_v62  ;;  %v126_v14 = vor.u32 %v125_v8, %v124_v0  ;;  %v215_v15 = vshll.u32 %v658_v55, %v212_v51  ;;  %v218_v28 = vshll.u32 %v659_v57, %v212_v51 }
  0x43   :  { %v131_v16 = vsel %vm127_vm2, %v111_v2, %v114_v9  ;;  %v132_v17 = vsel %vm130_vm4, %v120_v11, 2102212464  ;;  %v135_v18 = vsel %vm127_vm2, %v114_v9, %v117_v10  ;;  %v139_v19 = vsel %vm127_vm2, %v117_v10, %v120_v11 }
  0x44   :  { %v133_v24 = vsel %vm129_vm5, %v117_v10, %v132_v17  ;;  %v136_v25 = vsel %vm130_vm4, %v123_v13, 920167782  ;;  %v140_v27 = vsel %vm130_vm4, %v126_v14, 1326507024  ;;  %v214_v31 = vshrl.u32 %v658_v55, %v213_v12 }
  0x45   :  { %v137_v29 = vsel %vm129_vm5, %v120_v11, %v136_v25  ;;  %v141_v30 = vsel %vm129_vm5, %v123_v13, %v140_v27  ;;  %v216_v32 = vshrl.u32 %v659_v57, %v213_v12  ;;  %v134_v33 = vsel %vm128_vm3, %v131_v16, %v133_v24 }
  0x46   :  { %v138_v34 = vsel %vm128_vm3, %v135_v18, %v137_v29  ;;  %v142_v35 = vsel %vm128_vm3, %v139_v19, %v141_v30  ;;  %v219_v36 = vshrl.u32 %v660_v59, %v213_v12  ;;  %v221_v43 = vshll.u32 %v660_v59, %v212_v51 }
  0x47   :  { %v762_v37 = vmul.u32.u64.low %v730_v50, %v142_v35  ;;  %v763_v38 = vmul.u32.u64.high %v730_v50, %v142_v35, %v762_v37  ;;  %v766_v39 = vmul.u32.u64.low %v730_v50, %v138_v34  ;;  %v767_v40 = vmul.u32.u64.high %v730_v50, %v138_v34, %v766_v39 }
  0x48   :  { %v217_v41 = vor.u32 %v216_v32, %v215_v15  ;;  %v220_v42 = vor.u32 %v219_v36, %v218_v28  ;;  %v222_v45 = vshrl.u32 %v661_v61, %v213_v12  ;;  %v224_v46 = vshll.u32 %v661_v61, %v212_v51 }
  0x49   :  { %v225_v47 = vshrl.u32 %v662_v63, %v213_v12  ;;  %v227_v48 = vshll.u32 %v662_v63, %v212_v51  ;;  %v228_v54 = vshrl.u32 %v663_v7, %v213_v12  ;;  %v150_v56 = vmul.u32 %v730_v50, %v134_v33 }
  0x4a   :  { %v223_v58 = vor.u32 %v222_v45, %v221_v43  ;;  %vm230_vm7 = vcmp.lt.s32.totalorder %v741_v1, 1  ;;  %vm231_vm8 = vcmp.lt.s32.totalorder %v741_v1, 2  ;;  %vm152_vm9 = vc.u32 %v763_v38, %v766_v39 }
  0x4b   :  { %v153_v60 = vadd.s32 1, %v767_v40  ;;  %v226_v62 = vor.u32 %v225_v47, %v224_v46  ;;  %vm232_vm10 = vcmp.lt.s32.totalorder %v741_v1, 3  ;;  %v229_v0 = vor.u32 %v228_v54, %v227_v48 }
  0x4c   :  { %vm233_vm11 = vcmp.lt.s32.totalorder %v741_v1, 4  ;;  %v234_v51 = vsel %vm230_vm7, %v214_v31, %v217_v41  ;;  %v238_v2 = vsel %vm230_vm7, %v217_v41, %v220_v42  ;;  %v242_v5 = vsel %vm230_vm7, %v220_v42, %v223_v58 }
  0x4d   :  { %v154_v50 = vsel %vm152_vm9, %v153_v60, %v767_v40  ;;  %v235_v3 = vsel %vm233_vm11, %v223_v58, 2102212464  ;;  %v239_v4 = vsel %vm233_vm11, %v226_v62, 920167782  ;;  %v243_v10 = vsel %vm233_vm11, %v229_v0, 1326507024 }
  0x4e   :  { %v155_v6 = vadd.s32 %v154_v50, %v150_v56  ;;  %v236_v8 = vsel %vm232_vm10, %v220_v42, %v235_v3  ;;  %v240_v9 = vsel %vm232_vm10, %v223_v58, %v239_v4  ;;  %v244_v13 = vsel %vm232_vm10, %v226_v62, %v243_v10 }
  0x4f   :  { %v237_v11 = vsel %vm231_vm8, %v234_v51, %v236_v8  ;;  %v241_v12 = vsel %vm231_vm8, %v238_v2, %v240_v9  ;;  %v313_v14 = vsel %vm312_vm6, %v734_v53, 0  ;;  %v245_v16 = vsel %vm231_vm8, %v242_v5, %v244_v13 }
  0x50   :  { %v156_v15 = vadd.s32 536870912, %v155_v6  ;;  %v795_v17 = vmul.u32.u64.low %v732_v52, %v241_v12  ;;  %v796_v18 = vmul.u32.u64.high %v732_v52, %v241_v12, %v795_v17  ;;  %v308_v25 = vand.u32 8388607, %v301_v49 }
  0x51   :  { %v800_v19 = vmul.u32.u64.low %v732_v52, %v245_v16  ;;  %v801_v24 = vmul.u32.u64.high %v732_v52, %v245_v16, %v800_v19  ;;  %v315_v28 = vand.u32 31, %v313_v14  ;;  %v407_v53 = vand.u32 2139095040, %v727_v44 }
  0x52   :  { %v805_v27 = vshrl.u32 %v156_v15, 30  ;;  %v253_v1 = vmul.u32 %v732_v52, %v237_v11  ;;  %v256_v30 = vadd.s32 1, %v796_v18  ;;  %v309_v32 = vor.u32 8388608, %v308_v25 }
  0x53   :  { %v316_v31 = vsub.s32 32, %v315_v28  ;;  %vm255_vm12 = vc.u32 %v801_v24, %v795_v17  ;;  %v314_v35 = vshrl.u32 %v313_v14, 5  ;;  %v408_v36 = vshrl.u32 %v407_v53, 23 }
  0x54   :  { %v158_v29 = vshll.u32 %v805_v27, 30  ;;  %v257_v34 = vsel %vm255_vm12, %v256_v30, %v796_v18  ;;  %v318_v40 = vshll.u32 %v658_v55, %v315_v28  ;;  %v321_v41 = vshll.u32 %v659_v57, %v315_v28 }
  0x55   :  { %v258_v37 = vadd.s32 %v257_v34, %v253_v1  ;;  %v319_v52 = vshrl.u32 %v659_v57, %v316_v31  ;;  %v322_v43 = vshrl.u32 %v660_v59, %v316_v31  ;;  %v324_v45 = vshll.u32 %v660_v59, %v315_v28 }
  0x56   :  { %v813_v33 = vsub.s32 %v155_v6, %v158_v29  ;;  %v325_v46 = vshrl.u32 %v661_v61, %v316_v31  ;;  %v151_v47 = vadd.s32 %v766_v39, %v763_v38  ;;  %v327_v54 = vshll.u32 %v661_v61, %v315_v28 }
  0x57   :  { %v259_v48 = vadd.s32 536870912, %v258_v37  ;;  %v826_v56 = vshll.u32 %v309_v32, 8  ;;  %v317_v60 = vshrl.u32 %v658_v55, %v316_v31  ;;  %vm336_vm14 = vcmp.lt.s32.totalorder %v314_v35, 4 }
  0x58   :  { %v161_v42 = vsub.s32 0, %v813_v33  ;;  %v539_v62 = vadd.s32 4294967169, %v408_v36  ;;  %v320_v51 = vor.u32 %v319_v52, %v318_v40  ;;  %v328_v2 = vshrl.u32 %v662_v63, %v316_v31 }
  0x59   :  { %v831_v0 = vshrl.u32 %v259_v48, 30  ;;  %v330_v38 = vshll.u32 %v662_v63, %v315_v28  ;;  %v323_v50 = vor.u32 %v322_v43, %v321_v41  ;;  %v326_v3 = vor.u32 %v325_v46, %v324_v45 }
  0x5a   :  { %v528_v58 = vmin.u32 %v161_v42, %v813_v33  ;;  %v331_v4 = vshrl.u32 %v663_v7, %v316_v31  ;;  %v329_v6 = vor.u32 %v328_v2, %v327_v54  ;;  %vm333_vm15 = vcmp.lt.s32.totalorder %v314_v35, 1 }
  0x5b   :  { %v261_v5 = vshll.u32 %v831_v0, 30  ;;  %vm335_vm0 = vcmp.lt.s32.totalorder %v314_v35, 3  ;;  %vm334_vm1 = vcmp.lt.s32.totalorder %v314_v35, 2  ;;  %v338_v10 = vsel %vm336_vm14, %v326_v3, 2102212464 }
  0x5c   :  { %v163_v39 = vclz %v528_v58  ;;  %v332_v9 = vor.u32 %v331_v4, %v330_v38  ;;  %v181_v11 = vsub.s32 4, %v805_v27  ;;  %v337_v13 = vsel %vm333_vm15, %v317_v60, %v320_v51 }
  0x5d   :  { %v839_v12 = vsub.s32 %v258_v37, %v261_v5  ;;  %v342_v14 = vsel %vm336_vm14, %v329_v6, 920167782  ;;  %v341_v15 = vsel %vm333_vm15, %v320_v51, %v323_v50  ;;  %v339_v28 = vsel %vm335_vm0, %v323_v50, %v338_v10 }
  0x5e   :  { %v529_v8 = vadd.s32 4294967294, %v163_v39  ;;  %v343_v16 = vsel %vm335_vm0, %v326_v3, %v342_v14  ;;  %v346_v18 = vsel %vm336_vm14, %v332_v9, 1326507024  ;;  %v345_v53 = vsel %vm333_vm15, %v323_v50, %v326_v3 }
  0x5f   :  { %v264_v25 = vsub.s32 0, %v839_v12  ;;  %v347_v31 = vsel %vm335_vm0, %v329_v6, %v346_v18  ;;  %v182_v32 = vsel %vm97_vm13, %v181_v11, %v805_v27  ;;  %v344_v36 = vsel %vm334_vm1, %v341_v15, %v343_v16 }
  0x60   :  { %vm530_vm2 = vcmp.lt.s32.totalorder %v529_v8, 0  ;;  %v404_v37 = vand.u32 2147483647, %v727_v44  ;;  %v340_v41 = vsel %vm334_vm1, %v337_v13, %v339_v28  ;;  %v348_v42 = vsel %vm334_vm1, %v345_v53, %v347_v31 }
  0x61   :  { %v166_v19 = vsel %vm530_vm2, 0, %v529_v8  ;;  %v532_v34 = vmin.u32 %v264_v25, %v839_v12  ;;  %v860_v43 = vmul.u32.u64.low %v826_v56, %v348_v42  ;;  %v861_v45 = vmul.u32.u64.high %v826_v56, %v348_v42, %v860_v43 }
  0x62   :  { %v167_v1 = vsub.s32 32, %v166_v19  ;;  %v168_v29 = vshll.u32 %v813_v33, %v166_v19  ;;  %v171_v30 = vsub.s32 4294967266, %v166_v19  ;;  %v414_v46 = vadd.s32 1, %v539_v62 }
  0x63   :  { %v266_v33 = vclz %v532_v34  ;;  %v864_v54 = vmul.u32.u64.low %v826_v56, %v344_v36  ;;  %v865_v58 = vmul.u32.u64.high %v826_v56, %v344_v36, %v864_v54  ;;  %vm870_vm3 = vcmp.le.f32.partialorder %v95_v23, 0.7853982 }
  0x64   :  { %v169_v40 = vshrl.u32 %v151_v47, %v167_v1  ;;  %v172_v52 = vadd.s32 127, %v171_v30  ;;  %v876_v60 = vand.u32 8388607, %v404_v37  ;;  %vm415_vm4 = vcmp.gt.s32.totalorder %v414_v46, 0 }
  0x65   :  { %v533_v35 = vadd.s32 4294967294, %v266_v33  ;;  %v254_v2 = vadd.s32 %v795_v17, %v801_v24  ;;  %v416_v38 = vsel %vm415_vm4, %v414_v46, 0  ;;  %v184_v39 = vsel %vm870_vm3, 0, %v182_v32 }
  0x66   :  { %v170_v48 = vor.u32 %v169_v40, %v168_v29  ;;  %v173_v27 = vshll.u32 %v172_v52, 23  ;;  %v356_v23 = vmul.u32 %v826_v56, %v340_v41  ;;  %vm358_vm6 = vc.u32 %v861_v45, %v864_v54 }
  0x67   :  { %vm534_vm5 = vcmp.lt.s32.totalorder %v533_v35, 0  ;;  %v359_v4 = vadd.s32 1, %v865_v58  ;;  %v418_v5 = vand.u32 31, %v416_v38  ;;  %v412_v17 = vor.u32 8388608, %v876_v60 }
  0x68   :  { %v174_v62 = vor.u32 4788187, %v173_v27  ;;  %v177_v51 = vcvt.s32.f32 %v170_v48  ;;  %v269_v3 = vsel %vm534_vm5, 0, %v533_v35  ;;  %v888_v10 = vand.u32 3, %v184_v39 }
  0x69   :  { %v270_v6 = vsub.s32 32, %v269_v3  ;;  %v271_v8 = vshll.u32 %v839_v12, %v269_v3  ;;  %v274_v9 = vsub.s32 4294967266, %v269_v3  ;;  %v360_v11 = vsel %vm358_vm6, %v359_v4, %v865_v58 }
  0x6a   :  { %v175_v50 = vand.u32 2147483647, %v174_v62  ;;  %v419_v56 = vsub.s32 32, %v418_v5  ;;  %vm200_vm7 = vcmp.lt.s32.totalorder %v714_v21, 0  ;;  %v284_v15 = vsub.s32 4, %v831_v0 }
  0x6b   :  { %v272_v13 = vshrl.u32 %v254_v2, %v270_v6  ;;  %v275_v14 = vadd.s32 127, %v274_v9  ;;  %v361_v16 = vadd.s32 %v360_v11, %v356_v23  ;;  %v893_v19 = vshrl.u32 %v416_v38, 5 }
  0x6c   :  { %v178_v24 = vmul.f32 %v177_v51, %v175_v50  ;;  %v421_v12 = vshll.u32 %v658_v55, %v418_v5  ;;  %v424_v25 = vshll.u32 %v659_v57, %v418_v5  ;;  %vm899_vm8 = vcmp.le.f32.partialorder %v198_v26, 0.7853982 }
  0x6d   :  { %v273_v53 = vor.u32 %v272_v13, %v271_v8  ;;  %v276_v1 = vshll.u32 %v275_v14, 23  ;;  %v362_v29 = vadd.s32 536870912, %v361_v16  ;;  %v422_v30 = vshrl.u32 %v659_v57, %v419_v56 }
  0x6e   :  { %v179_v18 = vxor.u32 2147483648, %v178_v24  ;;  %v425_v32 = vshrl.u32 %v660_v59, %v419_v56  ;;  %v427_v34 = vshll.u32 %v660_v59, %v418_v5  ;;  %v428_v36 = vshrl.u32 %v661_v61, %v419_v56 }
  0x6f   :  { %v277_v40 = vor.u32 4788187, %v276_v1  ;;  %v280_v52 = vcvt.s32.f32 %v273_v53  ;;  %v912_v41 = vshrl.u32 %v362_v29, 30  ;;  %v430_v57 = vshll.u32 %v661_v61, %v418_v5 }
  0x70   :  { %v180_v31 = vsel %vm97_vm13, %v179_v18, %v178_v24  ;;  %v431_v42 = vshrl.u32 %v662_v63, %v419_v56  ;;  %vm436_vm9 = vcmp.lt.s32.totalorder %v893_v19, 1  ;;  %v423_v43 = vor.u32 %v422_v30, %v421_v12 }
  0x71   :  { %v183_v26 = vsel %vm870_vm3, %v712_v20, %v180_v31  ;;  %v278_v33 = vand.u32 2147483647, %v277_v40  ;;  %v364_v59 = vshll.u32 %v912_v41, 30  ;;  %v426_v46 = vor.u32 %v425_v32, %v424_v25 }
  0x72   :  { %568 = vcosq.f32 %v183_v26  ;;  %v432_v48 = vor.u32 %v431_v42, %v430_v57  ;;  %v433_v27 = vshll.u32 %v662_v63, %v418_v5  ;;  %v434_v58 = vshrl.u32 %v663_v7, %v419_v56 }
  0x73   :  { %570 = vsinq.f32 %v183_v26  ;;  %vm190_vm10 = vcmp.eq.s32.totalorder %v888_v10, 0  ;;  %v281_v47 = vmul.f32 %v280_v52, %v278_v33  ;;  %v921_v35 = vsub.s32 %v361_v16, %v364_v59 }
  0x74   :  { %v420_v61 = vshrl.u32 %v658_v55, %v419_v56  ;;  %v429_v60 = vor.u32 %v428_v36, %v427_v34  ;;  %vm193_vm11 = vcmp.eq.s32.totalorder %v888_v10, 2  ;;  %v285_v62 = vsel %vm200_vm7, %v284_v15, %v831_v0 }
  0x75   :  { %vm438_vm12 = vcmp.lt.s32.totalorder %v893_v19, 3  ;;  %vm439_vm13 = vcmp.lt.s32.totalorder %v893_v19, 4  ;;  %vm187_vm14 = vweird.f32 %v712_v20  ;;  %v282_v63 = vxor.u32 2147483648, %v281_v47 }
  0x76   :  { %v367_v7 = vsub.s32 0, %v921_v35  ;;  %v435_v51 = vor.u32 %v434_v58, %v433_v27  ;;  %v441_v55 = vsel %vm439_vm13, %v429_v60, 2102212464  ;;  %vm437_vm15 = vcmp.lt.s32.totalorder %v893_v19, 2 }
  0x77   :  { %v444_v2 = vsel %vm436_vm9, %v423_v43, %v426_v46  ;;  %v445_v0 = vsel %vm439_vm13, %v432_v48, 920167782  ;;  %v452_v38 = vshll.u32 %v412_v17, 8  ;;  %v283_v39 = vsel %vm200_vm7, %v282_v63, %v281_v47 }
  0x78   :  { %v287_v23 = vsel %vm899_vm8, 0, %v285_v62  ;;  %v536_v50 = vmin.u32 %v367_v7, %v921_v35  ;;  %v440_v3 = vsel %vm436_vm9, %v420_v61, %v423_v43  ;;  %v286_v4 = vsel %vm899_vm8, %v714_v21, %v283_v39 }
  0x79   :  { %v442_v5 = vsel %vm438_vm12, %v426_v46, %v441_v55  ;;  %v446_v6 = vsel %vm438_vm12, %v429_v60, %v445_v0  ;;  %v448_v8 = vsel %vm436_vm9, %v426_v46, %v429_v60  ;;  %572 = vcosq.f32 %v286_v4 }
  0x7a   :  { %v369_v9 = vclz %v536_v50  ;;  %v447_v17 = vsel %vm437_vm15, %v444_v2, %v446_v6  ;;  %v449_v24 = vsel %vm439_vm13, %v435_v51, 1326507024  ;;  %574 = vsinq.f32 %v286_v4 }
  0x7b   :  { %v450_v56 = vsel %vm438_vm12, %v432_v48, %v449_v24  ;;  %v961_v13 = vmul.u32.u64.low %v452_v38, %v447_v17  ;;  %v962_v14 = vmul.u32.u64.high %v452_v38, %v447_v17, %v961_v13  ;;  %v443_v12 = vsel %vm437_vm15, %v440_v3, %v442_v5 }
  0x7c   :  { %v569_v11 = vpop.eup %568  ;;  %v537_v18 = vadd.s32 4294967294, %v369_v9  ;;  %v451_v25 = vsel %vm437_vm15, %v448_v8, %v450_v56  ;;  %vm189_vm0 = vcmp.lt.s32.totalorder %v888_v10, 2  ;;  %v291_v30 = vand.u32 3, %v287_v23 }
  0x7d   :  { %v571_v15 = vpop.eup %570  ;;  %v194_v16 = vxor.u32 2147483648, %v569_v11  ;;  %v970_v53 = vmul.u32.u64.low %v452_v38, %v451_v25  ;;  %v971_v1 = vmul.u32.u64.high %v452_v38, %v451_v25, %v970_v53  ;;  %v357_v31 = vadd.s32 %v864_v54, %v861_v45 }
  0x7e   :  { %v191_v28 = vxor.u32 2147483648, %v571_v15  ;;  %vm538_vm1 = vcmp.lt.s32.totalorder %v537_v18, 0  ;;  %v459_v19 = vmul.u32 %v452_v38, %v443_v12  ;;  %v462_v36 = vadd.s32 1, %v962_v14 }
  0x7f   :  { %v195_v29 = vsel %vm193_vm11, %v194_v16, %v571_v15  ;;  %v372_v34 = vsel %vm538_vm1, 0, %v537_v18  ;;  %vm461_vm2 = vc.u32 %v971_v1, %v961_v13  ;;  %vm296_vm3 = vcmp.eq.s32.totalorder %v291_v30, 2 }
  0x80   :  { %v192_v32 = vsel %vm190_vm10, %v569_v11, %v191_v28  ;;  %v373_v40 = vsub.s32 32, %v372_v34  ;;  %v374_v52 = vshll.u32 %v921_v35, %v372_v34  ;;  %v377_v57 = vsub.s32 4294967266, %v372_v34 }
  0x81   :  { %v196_v26 = vsel %vm189_vm0, %v192_v32, %v195_v29  ;;  %v463_v10 = vsel %vm461_vm2, %v462_v36, %v962_v14  ;;  %vm293_vm4 = vcmp.eq.s32.totalorder %v291_v30, 0  ;;  %vm292_vm5 = vcmp.lt.s32.totalorder %v291_v30, 2 }
  0x82   :  { %v197_v42 = vsel %vm187_vm14, nan, %v196_v26  ;;  %v375_v45 = vshrl.u32 %v357_v31, %v373_v40  ;;  %v378_v54 = vadd.s32 127, %v377_v57  ;;  %v464_v33 = vadd.s32 %v463_v10, %v459_v19 }
  0x83   :  { %507 = vst [vmem:[#allocation7] sm:$0xff] %v197_v42  ;;  %v573_v59 = vpop.eup %572  ;;  %vm290_vm6 = vweird.f32 %v714_v21  ;;  %vm303_vm7 = vcmp.lt.s32.totalorder %v716_v22, 0  ;;  %vm302_vm8 = vcmp.le.f32.partialorder %v301_v49, 0.7853982  ;;  %v387_v39 = vsub.s32 4, %v912_v41 }
  0x84   :  { %v376_v43 = vor.u32 %v375_v45, %v374_v52  ;;  %v379_v46 = vshll.u32 %v378_v54, 23  ;;  %v575_v48 = vpop.eup %574  ;;  %v297_v27 = vxor.u32 2147483648, %v573_v59  ;;  %v465_v58 = vadd.s32 536870912, %v464_v33 }
  0x85   :  { %v294_v20 = vxor.u32 2147483648, %v575_v48  ;;  %v388_v4 = vsel %vm303_vm7, %v387_v39, %v912_v41  ;;  %v460_v9 = vadd.s32 %v961_v13, %v971_v1  ;;  %vm393_vm13 = vweird.f32 %v716_v22 }
  0x86   :  { %v380_v47 = vor.u32 4788187, %v379_v46  ;;  %v383_v35 = vcvt.s32.f32 %v376_v43  ;;  %v298_v61 = vsel %vm296_vm3, %v297_v27, %v575_v48  ;;  %v466_v60 = vshrl.u32 %v465_v58, 30 }
  0x87   :  { %v295_v62 = vsel %vm293_vm4, %v573_v59, %v294_v20  ;;  %v390_v6 = vsel %vm302_vm8, 0, %v388_v4  ;;  %vm406_vm14 = vcmp.lt.s32.totalorder %v727_v44, 0  ;;  %vm405_vm15 = vcmp.le.f32.partialorder %v404_v37, 0.7853982 }
  0x88   :  { %v381_v63 = vand.u32 2147483647, %v380_v47  ;;  %v299_v7 = vsel %vm292_vm5, %v295_v62, %v298_v61  ;;  %v467_v51 = vshll.u32 %v466_v60, 30  ;;  %v394_v49 = vand.u32 3, %v390_v6 }
  0x89   :  { %v300_v55 = vsel %vm290_vm6, nan, %v299_v7  ;;  %v490_v36 = vsub.s32 4, %v466_v60  ;;  %vm496_vm3 = vweird.f32 %v727_v44 }
  0x8a   :  { %v384_v2 = vmul.f32 %v383_v35, %v381_v63  ;;  %v468_v0 = vsub.s32 %v464_v33, %v467_v51  ;;  %508 = vst [vmem:[#allocation7 + $0x8] sm:$0xff] %v300_v55  ;;  %vm399_vm10 = vcmp.eq.s32.totalorder %v394_v49, 2  ;;  %vm396_vm11 = vcmp.eq.s32.totalorder %v394_v49, 0 }
  0x8b   :  { %vm395_vm12 = vcmp.lt.s32.totalorder %v394_v49, 2 }
  0x8c   :  { %v385_v38 = vxor.u32 2147483648, %v384_v2  ;;  %v470_v23 = vsub.s32 0, %v468_v0 }
  0x8e   :  { %v386_v21 = vsel %vm303_vm7, %v385_v38, %v384_v2  ;;  %v540_v3 = vmin.u32 %v470_v23, %v468_v0 }
  0x8f   :  { %v389_v50 = vsel %vm302_vm8, %v716_v22, %v386_v21  ;;  %v491_v22 = vsel %vm406_vm14, %v490_v36, %v466_v60 }
  0x90   :  { %576 = vcosq.f32 %v389_v50  ;;  %v472_v5 = vclz %v540_v3  ;;  %v493_v52 = vsel %vm405_vm15, 0, %v491_v22 }
  0x91   :  { %578 = vsinq.f32 %v389_v50  ;;  %v497_v57 = vand.u32 3, %v493_v52 }
  0x92   :  { %v541_v8 = vadd.s32 4294967294, %v472_v5 }
  0x93   :  { %vm502_vm0 = vcmp.eq.s32.totalorder %v497_v57, 2  ;;  %vm499_vm1 = vcmp.eq.s32.totalorder %v497_v57, 0  ;;  %vm498_vm2 = vcmp.lt.s32.totalorder %v497_v57, 2 }
  0x94   :  { %vm542_vm9 = vcmp.lt.s32.totalorder %v541_v8, 0 }
  0x95   :  { %v475_v17 = vsel %vm542_vm9, 0, %v541_v8 }
  0x96   :  { %v476_v24 = vsub.s32 32, %v475_v17  ;;  %v477_v11 = vshll.u32 %v468_v0, %v475_v17  ;;  %v480_v56 = vsub.s32 4294967266, %v475_v17 }
  0x98   :  { %v478_v14 = vshrl.u32 %v460_v9, %v476_v24  ;;  %v481_v15 = vadd.s32 127, %v480_v56 }
  0x9a   :  { %v577_v16 = vpop.eup %576  ;;  %v479_v12 = vor.u32 %v478_v14, %v477_v11  ;;  %v482_v25 = vshll.u32 %v481_v15, 23 }
  0x9b   :  { %v579_v18 = vpop.eup %578  ;;  %v400_v41 = vxor.u32 2147483648, %v577_v16 }
  0x9c   :  { %v397_v28 = vxor.u32 2147483648, %v579_v18  ;;  %v483_v53 = vor.u32 4788187, %v482_v25  ;;  %v486_v1 = vcvt.s32.f32 %v479_v12 }
  0x9d   :  { %v401_v13 = vsel %vm399_vm10, %v400_v41, %v579_v18 }
  0x9e   :  { %v398_v29 = vsel %vm396_vm11, %v577_v16, %v397_v28  ;;  %v484_v31 = vand.u32 2147483647, %v483_v53 }
  0x9f   :  { %v402_v30 = vsel %vm395_vm12, %v398_v29, %v401_v13 }
  0xa0   :  { %v403_v32 = vsel %vm393_vm13, nan, %v402_v30  ;;  %v487_v34 = vmul.f32 %v486_v1, %v484_v31 }
  0xa1   :  { %509 = vst [vmem:[#allocation7 + $0x10] sm:$0xff] %v403_v32 }
  0xa2   :  { %v488_v19 = vxor.u32 2147483648, %v487_v34 }
  0xa4   :  { %v489_v26 = vsel %vm406_vm14, %v488_v19, %v487_v34 }
  0xa5   :  { %v492_v40 = vsel %vm405_vm15, %v727_v44, %v489_v26 }
  0xa6   :  { %580 = vcosq.f32 %v492_v40 }
  0xa7   :  { %582 = vsinq.f32 %v492_v40 }
  0xb0   :  { %v581_v42 = vpop.eup %580 }
  0xb1   :  { %v583_v45 = vpop.eup %582  ;;  %v503_v54 = vxor.u32 2147483648, %v581_v42 }
  0xb2   :  { %v500_v10 = vxor.u32 2147483648, %v583_v45 }
  0xb3   :  { %v504_v37 = vsel %vm502_vm0, %v503_v54, %v583_v45 }
  0xb4   :  { %v501_v33 = vsel %vm499_vm1, %v581_v42, %v500_v10 }
  0xb5   :  { %v505_v59 = vsel %vm498_vm2, %v501_v33, %v504_v37 }
  0xb6   :  { %v506_v43 = vsel %vm496_vm3, nan, %v505_v59 }
  0xb7   :  { %510 = vst [vmem:[#allocation7 + $0x18] sm:$0xff] %v506_v43 }
  0xb8   :  { %639 = shalt.err (!%p636_p6)
}
  0xb9   :  { %s640_s13 = scalar_lea.hbm %s1016_s3, 512 }
  0xba   :  { %p641_p7 = scmp.ne.s32.totalorder %s1016_s3, %s640_s13  ;;  %p644_p8 = scmp.lt.u32.totalorder %s640_s13, %s1016_s3 }
  0xbc   :  { %p646_p9 = pnand %p644_p8, %p641_p7 }
  0xbe   :  { %649 = shalt.err (!%p646_p9)
}
  0xbf   :  { %520 = dma.vmem_to_hbm [thread:$0]  %s518_s2, 512, %s1016_s3, [#allocation4]  }
  0xc0   :  { %654 = dma.done.wait [#allocation4], 512  }
  0xc1   :  { %655 = vsyncadd [#allocation4], 4294966784 }
  0xc2   :  { %524 = vsyncpa [#allocation3], 1 }
  0xc3   :  { %525 = vsyncpa [#allocation6], 1 }
  0xc4   :  { %526 = vsyncpa [#allocation4], 1 }

</bundles_post_ra>
